<compile_context>
chip_gen: v6e
topology: v6e:2x2x1
jax: 0.10.0
libtpu: 0.0.40
codegen_flags: <defaults>
</compile_context>

<pallas_src>
import jax
import jax.numpy as jnp
from jax.experimental import pallas as pl
from jax.experimental.pallas import tpu as pltpu


def _identity_kernel(x_ref, o_ref):
    # Pure pass-through: full-tile VMEM load + store.
    o_ref[...] = x_ref[...]


# Candidate lane-dense widths (large multiples of 128), widest first.
_LANE_CANDIDATES = (8192, 4096, 2048, 1024, 512, 256, 128)


def _vmem_capacity_bytes() -> int:
    """Physical VMEM per TensorCore; conservative v7x default if unknown."""
    try:
        return int(pltpu.get_tpu_info().vmem_capacity_bytes)
    except Exception:
        return 64 * 1024 * 1024


def identity(x: jax.Array, *, force_kernel: bool = False) -> jax.Array:
    """Identity forward pass: y = x.

    Default is the zero-HBM-traffic fast path (`return x`). Set
    `force_kernel=True` to route through the Pallas copy kernel (framework
    parity / testing). NOTE: the kernel path does not alias its output, so it
    never requires buffer donation from the caller.
    """
    if not force_kernel:
        # Semantically optimal: zero HBM traffic.
        return x

    orig_shape = x.shape
    dtype = x.dtype
    n = x.size
    if n == 0:
        return x

    itemsize = jnp.dtype(dtype).itemsize

    # Generation-aware sizing.
    vmem_cap = _vmem_capacity_bytes()
    block_bytes = min(16 * 1024 * 1024, vmem_cap // 8)   # 8 MiB v7x, 16 MiB v5e/v6e
    vmem_limit = vmem_cap * 3 // 4                        # 48 MiB v7x, 96 MiB v5e/v6e
    cost = pl.CostEstimate(
        flops=0, transcendentals=0, bytes_accessed=2 * n * itemsize
    )

    # Widest lane-dense column count that divides n exactly (reshape of a
    # contiguous row-major array is then a free bitcast: no pad, no slice).
    cols = next((c for c in _LANE_CANDIDATES if n % c == 0), None)

    if cols is None:
        # Ragged element count (not a multiple of 128): single full-extent
        # block (allowed when block dims == full array dims). If it would not
        # fit the VMEM budget, fall back to the zero-copy path instead of the
        # old pad -> copy -> slice triple-pass.
        if 4 * n * itemsize > vmem_limit:
            return x
        x2d = x.reshape(1, n)
        out2d = pl.pallas_call(
            _identity_kernel,
            out_shape=jax.ShapeDtypeStruct((1, n), dtype),
            grid_spec=pltpu.PrefetchScalarGridSpec(
                num_scalar_prefetch=0,
                grid=(1,),
                in_specs=[pl.BlockSpec((1, n), lambda i: (0, 0))],
                out_specs=pl.BlockSpec((1, n), lambda i: (0, 0)),
            ),
            compiler_params=pltpu.CompilerParams(
                dimension_semantics=("arbitrary",),
                vmem_limit_bytes=vmem_limit,
            ),
            cost_estimate=cost,
        )(x2d)
        return out2d.reshape(orig_shape)

    rows = n // cols
    x2d = x.reshape(rows, cols)

    # Native sublane packing: 8 for 4-byte, 16 for 2-byte, 32 for 1-byte dtypes.
    sublane = max(8, 32 // itemsize)

    if rows <= sublane:
        # Full row extent (block dim == full array dim is allowed).
        tile_rows = rows
    else:
        target = max(sublane, (block_bytes // (cols * itemsize)) // sublane * sublane)
        tile_rows = min(target, (rows // sublane) * sublane)
        # Guarantee >= 2 grid steps when possible so v7x's two TensorCores can
        # each drive their own DMA stream (no-op on single-TC v5e/v6e).
        if -(-rows // tile_rows) < 2:
            half = ((rows // 2) // sublane) * sublane
            if half >= sublane:
                tile_rows = half

    grid = (pl.cdiv(rows, tile_rows),)

    out2d = pl.pallas_call(
        _identity_kernel,
        out_shape=jax.ShapeDtypeStruct((rows, cols), dtype),
        grid_spec=pltpu.PrefetchScalarGridSpec(
            num_scalar_prefetch=0,
            grid=grid,
            in_specs=[pl.BlockSpec((tile_rows, cols), lambda i: (i, 0))],
            out_specs=pl.BlockSpec((tile_rows, cols), lambda i: (i, 0)),
        ),
        compiler_params=pltpu.CompilerParams(
            dimension_semantics=("parallel",),
            vmem_limit_bytes=vmem_limit,
        ),
        cost_estimate=cost,
    )(x2d)
    return out2d.reshape(orig_shape)


if __name__ == "__main__":
    key = jax.random.PRNGKey(0)
    # Small NCHW image-like input consistent with the vision-policy context.
    x = jax.random.normal(key, (2, 4, 16, 16), dtype=jnp.float32)

    # Default fast path: zero-copy identity.
    y_fast = jax.block_until_ready(identity(x))
    assert y_fast.shape == x.shape and y_fast.dtype == x.dtype
    assert bool(jnp.all(y_fast == x)), "fast-path output does not match input"

    # Kernel path (framework parity): lane-dense tiled Pallas copy.
    y_kernel = jax.block_until_ready(identity(x, force_kernel=True))
    assert y_kernel.shape == x.shape and y_kernel.dtype == x.dtype
    assert bool(jnp.all(y_kernel == x)), "kernel output does not match input"

    # Ragged element count (not a multiple of 128): full-extent single block.
    x_ragged = jax.random.normal(jax.random.PRNGKey(0), (3, 5, 7), dtype=jnp.float32)
    y_ragged = jax.block_until_ready(identity(x_ragged, force_kernel=True))
    assert y_ragged.shape == x_ragged.shape and y_ragged.dtype == x_ragged.dtype
    assert bool(jnp.all(y_ragged == x_ragged)), "ragged kernel output mismatch"

    print("KERNEL_OK")
</pallas_src>

<mosaic_0001>
module attributes {stable_mosaic.version = 11 : i64} {
  func.func @_identity_kernel(%arg0: i32, %arg1: memref<1x2048xf32, #tpu.memory_space<vmem>>, %arg2: memref<1x2048xf32, #tpu.memory_space<vmem>>) attributes {dimension_semantics = [#tpu.dimension_semantics<parallel>], iteration_bounds = array<i64: 1>, scalar_prefetch = 0 : i64, scratch_operands = 0 : i64, tpu.core_type = #tpu.core_type<tc>, window_params = [{transform_indices = @transform_0, window_bounds = array<i64: 1, 2048>}, {transform_indices = @transform_1, window_bounds = array<i64: 1, 2048>}]} {
    %c0 = arith.constant 0 : index
    %c0_0 = arith.constant 0 : index
    %0 = vector.load %arg1[%c0, %c0_0] : memref<1x2048xf32, #tpu.memory_space<vmem>>, vector<1x2048xf32>
    %c0_1 = arith.constant 0 : index
    %c0_2 = arith.constant 0 : index
    %1 = vector.load %arg2[%c0_1, %c0_2] : memref<1x2048xf32, #tpu.memory_space<vmem>>, vector<1x2048xf32>
    tpu.vector_store %arg2[%c0_1, %c0_2], %0 {strides = array<i32>} : memref<1x2048xf32, #tpu.memory_space<vmem>>, vector<1x2048xf32>,
    return
  }
  func.func @transform_0(%arg0: i32) -> (i32, i32) {
    %c0_i32 = arith.constant 0 : i32
    %c0_i32_0 = arith.constant 0 : i32
    return %arg0, %c0_i32 : i32, i32
  }
  func.func @transform_1(%arg0: i32) -> (i32, i32) {
    %c0_i32 = arith.constant 0 : i32
    %c0_i32_0 = arith.constant 0 : i32
    return %arg0, %c0_i32 : i32, i32
  }
}

</mosaic_0001>

<bundles_post_ra>
// kernel: tpu_custom_call.1
= control target key start
LH: loop header
LB: loop body
LE: loop exit
PB: predicated region body
PF: predicated region fallthrough
CT: control target
= control target key end

     0   :  { %6 = vsyncpa [#allocation3], 0  ;;  %s104_s0 = inlined_call_operand.hbm [shape: f32[1,2048], index: 0, kind: input, shape index: {}]   ;;  %s105_s1 = inlined_call_operand.hbm [shape: f32[1,2048], index: 1, kind: output, shape index: {}]  }
   0x1   :  { %7 = vsyncpa [#allocation4], 0  ;;  %s86_s6 = smov [#allocation2]  }
   0x2   :  { %s14_s7 = sshll.u32 %s86_s6, 4  ;;  %s15_s7 = int_to_ptr.vmem [resolvable:$true] %s14_s7 }
   0x3   :  { %s50_s8 = scalar_lea.vmem %s15_s7, 256  ;;  %p55_p1 = scmp.lt.s32.totalorder %s15_s7, %s15_s7 }
   0x4   :  { %p51_p0 = scmp.ne.s32.totalorder %s15_s7, %s50_s8  ;;  %p56_p2 = scmp.lt.s32.totalorder %s50_s8, %s50_s8 }
   0x6   :  { %p57_p3 = por %p56_p2, %p55_p1 }
   0x8   :  { %p58_p4 = pnand %p57_p3, %p51_p0 }
   0xa   :  { %61 = shalt.err (!%p58_p4)
}
   0xb   :  { %17 = dma.hbm_to_vmem [thread:$0]  %s104_s0, 256, %s15_s7, [#allocation3]  }
   0xc   :  { %82 = dma.done.wait [#allocation3], 256  }
   0xd   :  { %83 = vsyncadd [#allocation3], 4294967040  ;;  %s87_s11 = smov [#allocation5]   ;;  %v21_v0 = vld [vmem:[#allocation2] sm:$0xff]  ;;  %v22_v1 = vld [vmem:[#allocation2 + $0x8] sm:$0xff] }
   0xe   :  { %s31_s12 = sshll.u32 %s87_s11, 4  ;;  %23 = vst [vmem:[#allocation5] sm:$0xff] %v21_v0  ;;  %24 = vst [vmem:[#allocation5 + $0x8] sm:$0xff] %v22_v1  ;;  %s32_s12 = int_to_ptr.vmem [resolvable:$true] %s31_s12 }
   0xf   :  { %s62_s13 = scalar_lea.vmem %s32_s12, 256  ;;  %p67_p6 = scmp.lt.s32.totalorder %s32_s12, %s32_s12 }
  0x10   :  { %p63_p5 = scmp.ne.s32.totalorder %s32_s12, %s62_s13  ;;  %p68_p7 = scmp.lt.s32.totalorder %s62_s13, %s62_s13 }
  0x12   :  { %p69_p8 = por %p68_p7, %p67_p6 }
  0x14   :  { %p70_p9 = pnand %p69_p8, %p63_p5 }
  0x16   :  { %73 = shalt.err (!%p70_p9)
}
  0x17   :  { %34 = dma.vmem_to_hbm [thread:$0]  %s32_s12, 256, %s105_s1, [#allocation4]  }
  0x18   :  { %84 = dma.done.wait [#allocation4], 256  }
  0x19   :  { %85 = vsyncadd [#allocation4], 4294967040 }
  0x1a   :  { %38 = vsyncpa [#allocation3], 1 }
  0x1b   :  { %39 = vsyncpa [#allocation4], 1 }

</bundles_post_ra>
